<compile_context>
chip_gen: v6e
topology: v6e:2x2x1
jax: 0.10.0
libtpu: 0.0.40
codegen_flags: <defaults>
</compile_context>

<pallas_src>
import jax
import jax.numpy as jnp
from jax.experimental import pallas as pl
from jax.experimental.pallas import tpu as pltpu

_LANE = 128
_SUBLANE = 8
_TARGET_TILE_BYTES = 4 * 1024 * 1024  # per input, per pipeline buffer


def _round_up(x, m):
    return (x + m - 1) // m * m


def _dice_kernel(yt_ref, yp_ref, out_ref, inter_acc, msum_acc):
    k = pl.program_id(1)

    @pl.when(k == 0)
    def _():
        inter_acc[...] = jnp.zeros_like(inter_acc)
        msum_acc[...] = jnp.zeros_like(msum_acc)

    yt = yt_ref[...].astype(jnp.float32)   # (tn, rows_tile, 128)
    yp = yp_ref[...].astype(jnp.float32)

    # Lane-wise partial sums only: reduce over the rows/sublane axis (mostly
    # plain vreg adds on the VPU).  The cross-lane reduce happens once, at the
    # end, not per grid step.
    inter_acc[...] += jnp.sum(jnp.abs(yp * yt), axis=1)              # (tn, 128)
    # Fused mask-sum reduce: one reduce chain instead of two.
    msum_acc[...] += jnp.sum(jnp.abs(yt) + jnp.abs(yp), axis=1)      # (tn, 128)

    @pl.when(k == pl.num_programs(1) - 1)
    def _():
        smooth = jnp.float32(1e-6)
        inter = jnp.sum(inter_acc[...], axis=1, keepdims=True)       # (tn, 1)
        msum = jnp.sum(msum_acc[...], axis=1, keepdims=True)         # (tn, 1)
        out_ref[...] = 1.0 - 2.0 * (inter + smooth) / (msum + smooth)


def dice_loss(y_true, y_pred):
    """Mirrors TestDiceLoss.forward(y_true, y_pred) -> per-sample dice (N,)."""
    assert y_true.shape == y_pred.shape
    assert y_true.ndim >= 2
    n = y_true.shape[0]
    d = 1
    for s in y_true.shape[1:]:
        d *= s

    # ---- choose tiling ----------------------------------------------------
    rows = pl.cdiv(d, _LANE)                     # D laid out as (rows, 128)
    tn = max(1, min(n, 8))                       # samples per block

    itemsize = max(jnp.dtype(y_true.dtype).itemsize,
                   jnp.dtype(y_pred.dtype).itemsize)
    max_rows = _TARGET_TILE_BYTES // (tn * _LANE * itemsize)
    max_rows = max(_SUBLANE, (max_rows // _SUBLANE) * _SUBLANE)

    rows_tile = min(_round_up(rows, _SUBLANE), max_rows)
    rows_pad = _round_up(rows, rows_tile)
    d_pad = rows_pad * _LANE
    n_pad = _round_up(n, tn)

    def prep(x):
        x = x.reshape(n, d)
        if d_pad != d:
            x = jnp.pad(x, ((0, 0), (0, d_pad - d)))   # zero pad: exact sums
        if n_pad != n:
            x = jnp.pad(x, ((0, n_pad - n), (0, 0)))
        return x.reshape(n_pad, rows_pad, _LANE)

    yt3 = prep(y_true)
    yp3 = prep(y_pred)

    grid = (n_pad // tn, rows_pad // rows_tile)
    in_block = pl.BlockSpec((tn, rows_tile, _LANE), lambda i, k: (i, k, 0))

    out = pl.pallas_call(
        _dice_kernel,
        out_shape=jax.ShapeDtypeStruct((n_pad, 1), jnp.float32),
        grid_spec=pltpu.PrefetchScalarGridSpec(
            num_scalar_prefetch=0,
            grid=grid,
            in_specs=[in_block, in_block],
            out_specs=pl.BlockSpec((tn, 1), lambda i, k: (i, 0)),
            scratch_shapes=[
                pltpu.VMEM((tn, _LANE), jnp.float32),  # intersection partials
                pltpu.VMEM((tn, _LANE), jnp.float32),  # mask-sum partials
            ],
        ),
        compiler_params=pltpu.CompilerParams(
            dimension_semantics=("parallel", "arbitrary"),
            vmem_limit_bytes=32 * 1024 * 1024,
        ),
    )(yt3, yp3)

    return out[:n, 0]


if __name__ == "__main__":
    key = jax.random.PRNGKey(0)
    k1, k2 = jax.random.split(key)

    # Small shapes consistent with a binary segmentation map: (N, C, H, W).
    N, C, H, W = 2, 4, 16, 16
    y_true = (jax.random.uniform(k1, (N, C, H, W)) > 0.5).astype(jnp.float32)
    y_pred = jax.random.uniform(k2, (N, C, H, W), dtype=jnp.float32)

    dice = dice_loss(y_true, y_pred)
    dice = jax.block_until_ready(dice)

    # Reference check in plain JAX (same math as the PyTorch module).
    inter = jnp.sum(jnp.abs(y_pred * y_true), axis=(1, 2, 3))
    msum = (jnp.sum(jnp.abs(y_true), axis=(1, 2, 3))
            + jnp.sum(jnp.abs(y_pred), axis=(1, 2, 3)))
    ref = 1.0 - 2.0 * (inter + 1e-6) / (msum + 1e-6)
    assert dice.shape == (N,)
    assert jnp.allclose(dice, ref, atol=1e-5, rtol=1e-5)

    print("KERNEL_OK")
</pallas_src>

<mosaic_0001>
module attributes {stable_mosaic.version = 11 : i64} {
  func.func @_dice_kernel(%arg0: i32, %arg1: i32, %arg2: memref<2x8x128xf32, #tpu.memory_space<vmem>>, %arg3: memref<2x8x128xf32, #tpu.memory_space<vmem>>, %arg4: memref<2x1xf32, #tpu.memory_space<vmem>>, %arg5: memref<2x128xf32, #tpu.memory_space<vmem>>, %arg6: memref<2x128xf32, #tpu.memory_space<vmem>>) attributes {dimension_semantics = [#tpu.dimension_semantics<parallel>, #tpu.dimension_semantics<arbitrary>], iteration_bounds = array<i64: 1, 1>, scalar_prefetch = 0 : i64, scratch_operands = 2 : i64, tpu.core_type = #tpu.core_type<tc>, window_params = [{transform_indices = @transform_0, window_bounds = array<i64: 2, 8, 128>}, {transform_indices = @transform_1, window_bounds = array<i64: 2, 8, 128>}, {transform_indices = @transform_2, window_bounds = array<i64: 2, 1>}]} {
    %c0_i32 = arith.constant 0 : i32
    %0 = arith.cmpi eq, %arg1, %c0_i32 : i32
    %1 = arith.extui %0 : i1 to i32
    %c0_i32_0 = arith.constant 0 : i32
    %2 = arith.cmpi ne, %1, %c0_i32_0 : i32
    scf.if %2 {
      %cst_17 = arith.constant 0.000000e+00 : f32
      %21 = vector.broadcast %cst_17 : f32 to vector<2x128xf32>
      %c0_18 = arith.constant 0 : index
      %c0_19 = arith.constant 0 : index
      %22 = vector.load %arg5[%c0_18, %c0_19] : memref<2x128xf32, #tpu.memory_space<vmem>>, vector<2x128xf32>
      tpu.vector_store %arg5[%c0_18, %c0_19], %21 {strides = array<i32>} : memref<2x128xf32, #tpu.memory_space<vmem>>, vector<2x128xf32>,
      %cst_20 = arith.constant 0.000000e+00 : f32
      %23 = vector.broadcast %cst_20 : f32 to vector<2x128xf32>
      %c0_21 = arith.constant 0 : index
      %c0_22 = arith.constant 0 : index
      %24 = vector.load %arg6[%c0_21, %c0_22] : memref<2x128xf32, #tpu.memory_space<vmem>>, vector<2x128xf32>
      tpu.vector_store %arg6[%c0_21, %c0_22], %23 {strides = array<i32>} : memref<2x128xf32, #tpu.memory_space<vmem>>, vector<2x128xf32>,
    } else {
    }
    %c0 = arith.constant 0 : index
    %c0_1 = arith.constant 0 : index
    %c0_2 = arith.constant 0 : index
    %3 = vector.load %arg2[%c0, %c0_1, %c0_2] : memref<2x8x128xf32, #tpu.memory_space<vmem>>, vector<2x8x128xf32>
    %c0_3 = arith.constant 0 : index
    %c0_4 = arith.constant 0 : index
    %c0_5 = arith.constant 0 : index
    %4 = vector.load %arg3[%c0_3, %c0_4, %c0_5] : memref<2x8x128xf32, #tpu.memory_space<vmem>>, vector<2x8x128xf32>
    %c0_6 = arith.constant 0 : index
    %c0_7 = arith.constant 0 : index
    %5 = vector.load %arg5[%c0_6, %c0_7] : memref<2x128xf32, #tpu.memory_space<vmem>>, vector<2x128xf32>
    %6 = arith.mulf %4, %3 : vector<2x8x128xf32>
    %7 = math.absf %6 : vector<2x8x128xf32>
    %cst = arith.constant dense<0.000000e+00> : vector<2x128xf32>
    %8 = vector.multi_reduction <add>, %7, %cst [1] : vector<2x8x128xf32> to vector<2x128xf32>
    %9 = arith.addf %5, %8 : vector<2x128xf32>
    %c0_8 = arith.constant 0 : index
    %c0_9 = arith.constant 0 : index
    %10 = vector.load %arg5[%c0_8, %c0_9] : memref<2x128xf32, #tpu.memory_space<vmem>>, vector<2x128xf32>
    tpu.vector_store %arg5[%c0_8, %c0_9], %9 {strides = array<i32>} : memref<2x128xf32, #tpu.memory_space<vmem>>, vector<2x128xf32>,
    %c0_10 = arith.constant 0 : index
    %c0_11 = arith.constant 0 : index
    %11 = vector.load %arg6[%c0_10, %c0_11] : memref<2x128xf32, #tpu.memory_space<vmem>>, vector<2x128xf32>
    %12 = math.absf %3 : vector<2x8x128xf32>
    %13 = math.absf %4 : vector<2x8x128xf32>
    %14 = arith.addf %12, %13 : vector<2x8x128xf32>
    %cst_12 = arith.constant dense<0.000000e+00> : vector<2x128xf32>
    %15 = vector.multi_reduction <add>, %14, %cst_12 [1] : vector<2x8x128xf32> to vector<2x128xf32>
    %16 = arith.addf %11, %15 : vector<2x128xf32>
    %c0_13 = arith.constant 0 : index
    %c0_14 = arith.constant 0 : index
    %17 = vector.load %arg6[%c0_13, %c0_14] : memref<2x128xf32, #tpu.memory_space<vmem>>, vector<2x128xf32>
    tpu.vector_store %arg6[%c0_13, %c0_14], %16 {strides = array<i32>} : memref<2x128xf32, #tpu.memory_space<vmem>>, vector<2x128xf32>,
    %c0_i32_15 = arith.constant 0 : i32
    %18 = arith.cmpi eq, %arg1, %c0_i32_15 : i32
    %19 = arith.extui %18 : i1 to i32
    %c0_i32_16 = arith.constant 0 : i32
    %20 = arith.cmpi ne, %19, %c0_i32_16 : i32
    scf.if %20 {
      %c0_17 = arith.constant 0 : index
      %c0_18 = arith.constant 0 : index
      %21 = vector.load %arg5[%c0_17, %c0_18] : memref<2x128xf32, #tpu.memory_space<vmem>>, vector<2x128xf32>
      %cst_19 = arith.constant dense<0.000000e+00> : vector<2xf32>
      %22 = vector.multi_reduction <add>, %21, %cst_19 [1] : vector<2x128xf32> to vector<2xf32>
      %23 = vector.shape_cast %22 : vector<2xf32> to vector<2x1xf32>
      %c0_20 = arith.constant 0 : index
      %c0_21 = arith.constant 0 : index
      %24 = vector.load %arg6[%c0_20, %c0_21] : memref<2x128xf32, #tpu.memory_space<vmem>>, vector<2x128xf32>
      %cst_22 = arith.constant dense<0.000000e+00> : vector<2xf32>
      %25 = vector.multi_reduction <add>, %24, %cst_22 [1] : vector<2x128xf32> to vector<2xf32>
      %26 = vector.shape_cast %25 : vector<2xf32> to vector<2x1xf32>
      %cst_23 = arith.constant 9.99999997E-7 : f32
      %27 = vector.broadcast %cst_23 : f32 to vector<2x1xf32>
      %28 = arith.addf %23, %27 : vector<2x1xf32>
      %cst_24 = arith.constant 2.000000e+00 : f32
      %29 = vector.broadcast %cst_24 : f32 to vector<2x1xf32>
      %30 = arith.mulf %29, %28 : vector<2x1xf32>
      %cst_25 = arith.constant 9.99999997E-7 : f32
      %31 = vector.broadcast %cst_25 : f32 to vector<2x1xf32>
      %32 = arith.addf %26, %31 : vector<2x1xf32>
      %33 = arith.divf %30, %32 : vector<2x1xf32>
      %cst_26 = arith.constant 1.000000e+00 : f32
      %34 = vector.broadcast %cst_26 : f32 to vector<2x1xf32>
      %35 = arith.subf %34, %33 : vector<2x1xf32>
      %c0_27 = arith.constant 0 : index
      %c0_28 = arith.constant 0 : index
      %36 = vector.load %arg4[%c0_27, %c0_28] : memref<2x1xf32, #tpu.memory_space<vmem>>, vector<2x1xf32>
      tpu.vector_store %arg4[%c0_27, %c0_28], %35 {strides = array<i32>} : memref<2x1xf32, #tpu.memory_space<vmem>>, vector<2x1xf32>,
    } else {
    }
    return
  }
  func.func @transform_0(%arg0: i32, %arg1: i32) -> (i32, i32, i32) {
    %c0_i32 = arith.constant 0 : i32
    %c0_i32_0 = arith.constant 0 : i32
    return %arg0, %arg1, %c0_i32 : i32, i32, i32
  }
  func.func @transform_1(%arg0: i32, %arg1: i32) -> (i32, i32, i32) {
    %c0_i32 = arith.constant 0 : i32
    %c0_i32_0 = arith.constant 0 : i32
    return %arg0, %arg1, %c0_i32 : i32, i32, i32
  }
  func.func @transform_2(%arg0: i32, %arg1: i32) -> (i32, i32) {
    %c0_i32 = arith.constant 0 : i32
    %c0_i32_0 = arith.constant 0 : i32
    return %arg0, %c0_i32 : i32, i32
  }
}

</mosaic_0001>

<bundles_post_ra>
// kernel: tpu_custom_call.1
= control target key start
LH: loop header
LB: loop body
LE: loop exit
PB: predicated region body
PF: predicated region fallthrough
CT: control target
= control target key end

     0   :  { %7 = vsyncpa [#allocation5], 0  ;;  %s204_s0 = inlined_call_operand.hbm [shape: f32[2,8,128], index: 0, kind: input, shape index: {}]   ;;  %s205_s1 = inlined_call_operand.hbm [shape: f32[2,8,128], index: 1, kind: input, shape index: {}]   ;;  %s206_s2 = inlined_call_operand.vmem [shape: f32[2,1], index: 2, kind: output, shape index: {}]  }
   0x1   :  { %8 = vsyncpa [#allocation7], 0  ;;  %s175_s9 = smov [#allocation4]  }
   0x2   :  { %s14_s10 = sshll.u32 %s175_s9, 4  ;;  %s15_s10 = int_to_ptr.vmem [resolvable:$true] %s14_s10 }
   0x3   :  { %s139_s11 = scalar_lea.vmem %s15_s10, 256  ;;  %p144_p1 = scmp.lt.s32.totalorder %s15_s10, %s15_s10 }
   0x4   :  { %p140_p0 = scmp.ne.s32.totalorder %s15_s10, %s139_s11  ;;  %p145_p2 = scmp.lt.s32.totalorder %s139_s11, %s139_s11 }
   0x6   :  { %p146_p3 = por %p145_p2, %p144_p1 }
   0x8   :  { %p147_p4 = pnand %p146_p3, %p140_p0 }
   0xa   :  { %150 = shalt.err (!%p147_p4)
}
   0xb   :  { %s176_s12 = smov 128   ;;  %s177_s13 = smov 8  }
   0xc   :  { %20 = dma.hbm_to_vmem [thread:$0]  %s204_s0, 256, %s15_s10, [#allocation5], %s176_s12, %s176_s12, %s177_s13  }
   0xd   :  { %s178_s16 = smov [#allocation6]  }
   0xe   :  { %s26_s17 = sshll.u32 %s178_s16, 4  ;;  %s27_s17 = int_to_ptr.vmem [resolvable:$true] %s26_s17 }
   0xf   :  { %s159_s18 = scalar_lea.vmem %s27_s17, 256  ;;  %p164_p6 = scmp.lt.s32.totalorder %s27_s17, %s27_s17 }
  0x10   :  { %p160_p5 = scmp.ne.s32.totalorder %s27_s17, %s159_s18  ;;  %p165_p7 = scmp.lt.s32.totalorder %s159_s18, %s159_s18 }
  0x12   :  { %p166_p8 = por %p165_p7, %p164_p6 }
  0x14   :  { %p167_p9 = pnand %p166_p8, %p160_p5 }
  0x16   :  { %170 = shalt.err (!%p167_p9)
}
  0x17   :  { %32 = dma.hbm_to_vmem [thread:$0]  %s205_s1, 256, %s27_s17, [#allocation7], %s176_s12, %s176_s12, %s177_s13  }
  0x18   :  { %171 = dma.done.wait [#allocation5], 256  }
  0x19   :  { %172 = vsyncadd [#allocation5], 4294967040 }
  0x1a   :  { %173 = dma.done.wait [#allocation7], 256  }
  0x1b   :  { %174 = vsyncadd [#allocation7], 4294967040  ;;  %v179_v0 = vmov 0.0   ;;  %v45_v1 = vld [vmem:[#allocation4] sm:$0xff]  ;;  %v46_v2 = vld [vmem:[#allocation4 + $0x8] sm:$0xff]  ;;  %vm68_vm0 = vcmask 1041409  }
  0x1c   :  { %44 = vst [vmem:[#allocation3] sm:$0x3] %v179_v0  ;;  %43 = vst [vmem:[#allocation2] sm:$0x3] %v179_v0  ;;  %v47_v3 = vld [vmem:[#allocation6] sm:$0xff]  ;;  %v48_v4 = vld [vmem:[#allocation6 + $0x8] sm:$0xff] }
  0x1d   :  { %v74_v5 = vand.u32 2147483647, %v45_v1  ;;  %v50_v6 = vmul.f32 %v47_v3, %v45_v1  ;;  %v75_v7 = vand.u32 2147483647, %v46_v2  ;;  %v76_v8 = vand.u32 2147483647, %v47_v3 }
  0x1e   :  { %v77_v9 = vand.u32 2147483647, %v48_v4  ;;  %v51_v10 = vmul.f32 %v48_v4, %v46_v2  ;;  %vm102_vm1 = vcmask 1041408   ;;  %vm116_vm2 = vcmask 1024  }
  0x1f   :  { %v52_v11 = vand.u32 2147483647, %v50_v6  ;;  %v78_v12 = vadd.f32 %v76_v8, %v74_v5 }
  0x20   :  { %v79_v13 = vadd.f32 %v77_v9, %v75_v7  ;;  %v53_v14 = vand.u32 2147483647, %v51_v10 }
  0x21   :  { %v54_v15 = vrot.slane %v52_v11, 4  ;;  %v80_v16 = vrot.slane %v78_v12, 4 }
  0x22   :  { %v86_v17 = vrot.slane %v79_v13, 4  ;;  %v60_v18 = vrot.slane %v53_v14, 4 }
  0x23   :  { %v55_v19 = vadd.f32 %v54_v15, %v52_v11  ;;  %v81_v20 = vadd.f32 %v80_v16, %v78_v12  ;;  %v73_v36 = vld [vmem:[#allocation3] sm:$0x3]  ;;  %v49_v39 = vld [vmem:[#allocation2] sm:$0x3] }
  0x24   :  { %v87_v21 = vadd.f32 %v86_v17, %v79_v13  ;;  %v61_v22 = vadd.f32 %v60_v18, %v53_v14 }
  0x25   :  { %v56_v23 = vrot.slane %v55_v19, 2  ;;  %v82_v24 = vrot.slane %v81_v20, 2 }
  0x26   :  { %v88_v25 = vrot.slane %v87_v21, 2  ;;  %v62_v26 = vrot.slane %v61_v22, 2 }
  0x27   :  { %v57_v27 = vadd.f32 %v56_v23, %v55_v19  ;;  %v83_v28 = vadd.f32 %v82_v24, %v81_v20 }
  0x28   :  { %v89_v29 = vadd.f32 %v88_v25, %v87_v21  ;;  %v63_v30 = vadd.f32 %v62_v26, %v61_v22 }
  0x29   :  { %v58_v31 = vrot.slane %v57_v27, 1  ;;  %v84_v32 = vrot.slane %v83_v28, 1 }
  0x2a   :  { %v90_v33 = vrot.slane %v89_v29, 1  ;;  %v64_v34 = vrot.slane %v63_v30, 1 }
  0x2b   :  { %v59_v35 = vadd.f32 %v58_v31, %v57_v27  ;;  %v85_v37 = vadd.f32 %v84_v32, %v83_v28 }
  0x2c   :  { %v91_v38 = vadd.f32 %v90_v33, %v89_v29  ;;  %v65_v40 = vadd.f32 %v64_v34, %v63_v30 }
  0x2e   :  { %v94_v41 = vsel %vm68_vm0, %v91_v38, %v85_v37  ;;  %v69_v42 = vsel %vm68_vm0, %v65_v40, %v59_v35 }
  0x2f   :  { %v96_v43 = vadd.f32 %v94_v41, %v73_v36  ;;  %v71_v44 = vadd.f32 %v69_v42, %v49_v39 }
  0x31   :  { %97 = vst [vmem:[#allocation3] sm:$0x3] %v96_v43  ;;  %72 = vst [vmem:[#allocation2] sm:$0x3] %v71_v44 }
  0x38   :  { %v106_v45 = vld [vmem:[#allocation3] sm:$0x3]  ;;  %v101_v46 = vld [vmem:[#allocation2] sm:$0x3] }
  0x39   :  { %v107_v47 = vsel %vm102_vm1, %v106_v45, 0.0  ;;  %v103_v48 = vsel %vm102_vm1, %v101_v46, 0.0 }
  0x3a   :  { %108 = vadd.xlane.f32.xlu0 %v107_v47 }
  0x3e   :  { %104 = vadd.xlane.f32.xlu0 %v103_v48 }
  0xc3   :  { %v109_v49 = vpop.xlane.xlu0 %108 }
  0xc4   :  { %v112_v50 = vadd.f32 1e-06, %v109_v49 }
  0xc6   :  { %129 = vrcp.f32 %v112_v50 }
  0xc7   :  { %v105_v51 = vpop.xlane.xlu0 %104 }
  0xc8   :  { %v110_v52 = vadd.f32 1e-06, %v105_v51 }
  0xca   :  { %v111_v53 = vmul.f32 2.0, %v110_v52 }
  0xd3   :  { %v130_v54 = vpop.eup %129 }
  0xd4   :  { %v114_v55 = vmul.f32 %v130_v54, %v111_v53 }
  0xd6   :  { %v115_v56 = vsub.f32 1.0, %v114_v55 }
  0xd8   :  { %117 = vst.msk [vmem:[%s206_s2] sm:$0x3] %vm116_vm2, %v115_v56 }
  0xd9   :  { %122 = vsyncpa [#allocation5], 1 }
  0xda   :  { %123 = vsyncpa [#allocation7], 1 }

</bundles_post_ra>
